<compile_context>
chip_gen: v5e
topology: v5e:2x2
jax: 0.10.0
libtpu: 0.0.40
codegen_flags: <defaults>
</compile_context>

<pallas_src>
import functools

import jax
import jax.numpy as jnp
from jax.experimental import pallas as pl
from jax.experimental.pallas import tpu as pltpu


LEAKY_SLOPE = 0.1
LN_EPS = 1e-5


def _round_up(x, m):
    return ((x + m - 1) // m) * m


# ------------------------------ kernel ---------------------------------

def a2c_head_kernel(f1_ref, f2_ref, wt_ref, wb_ref, b_ref, g2_ref, b2_ref,
                    out_ref, *, n_total, hidden):
    # One fused lane-dense MXU pass: columns [0, n_total) are actor logits,
    # columns [n_total, n_total + hidden) are the critic-1 pre-activation,
    # remaining columns are zero padding.
    y = (jnp.dot(f1_ref[...], wt_ref[...], preferred_element_type=jnp.float32)
         + jnp.dot(f2_ref[...], wb_ref[...], preferred_element_type=jnp.float32)
         + b_ref[...])                                             # (TB, 128)

    col = jax.lax.broadcasted_iota(jnp.int32, y.shape, 1)
    hid = jnp.logical_and(col >= n_total, col < n_total + hidden)

    # Critic: LeakyReLU(0.1) -> LayerNorm statistics, computed at full
    # 128-lane width with masks (leaky(0) == 0 keeps masked lanes neutral).
    h = jnp.where(hid, y, 0.0)
    h = jnp.where(h > 0, h, LEAKY_SLOPE * h)
    inv_h = 1.0 / float(hidden)
    mu = jnp.sum(h, axis=-1, keepdims=True) * inv_h
    c = jnp.where(hid, h - mu, 0.0)
    var = jnp.sum(c * c, axis=-1, keepdims=True) * inv_h

    # Folded (LayerNorm affine + critic-2 Linear): g2 = gamma*w2 is zero
    # outside the hidden range; b2' = b2 + sum(beta*w2) is an SMEM scalar.
    val = (jax.lax.rsqrt(var + LN_EPS)
           * jnp.sum(c * g2_ref[...], axis=-1, keepdims=True)
           + b2_ref[0])                                            # (TB, 1)

    # Lane-dense output slab: logits in cols [0, n_total), value at column
    # n_total, zeros elsewhere.  One unmasked full-width store.
    out = jnp.where(col < n_total, y, 0.0)
    out_ref[...] = out + jnp.where(col == n_total, val, 0.0)


# --------------------- host-side weight packing --------------------------
# Called ONCE per weight update, never per forward step.

def pack_params(params):
    wa, ba = params["wa"], params["ba"]        # actor: (2F, n_total), (1, n_total)
    w1, b1 = params["w1"], params["b1"]        # critic-1: (2F, H), (1, H)
    D, n_total = wa.shape
    F = D // 2
    hidden = w1.shape[1]
    ncols = _round_up(max(n_total + hidden, n_total + 1), 128)

    wpk = jnp.zeros((D, ncols), jnp.float32)
    wpk = wpk.at[:, :n_total].set(wa)
    wpk = wpk.at[:, n_total:n_total + hidden].set(w1)

    bpk = jnp.zeros((1, ncols), jnp.float32)
    bpk = bpk.at[:, :n_total].set(ba)
    bpk = bpk.at[:, n_total:n_total + hidden].set(b1)

    # Fold LayerNorm affine + critic-2 weight: val = rs * sum(c*g2) + b2'.
    w2_row = params["w2"].reshape(1, hidden)
    g2_row = params["gamma"].reshape(1, hidden) * w2_row
    g2 = jnp.zeros((1, ncols), jnp.float32)
    g2 = g2.at[:, n_total:n_total + hidden].set(g2_row)
    b2p = (params["b2"].reshape(()) +
           jnp.sum(params["beta"].reshape(1, hidden) * w2_row)).reshape(1)

    packed = dict(wt=wpk[:F], wb=wpk[F:], b=bpk, g2=g2,
                  b2=b2p.astype(jnp.float32))
    meta = dict(n_total=int(n_total), hidden=int(hidden), ncols=int(ncols))
    return packed, meta


# ------------------------------ wrapper ---------------------------------

@functools.partial(jax.jit,
                   static_argnames=("n_total", "hidden", "ncols", "nvec"))
def a2c_forward(f1, f2, packed, *, n_total, hidden, ncols, nvec):
    """Fused actor/critic head forward; returns (policy list, value, feature)."""
    B, F = f1.shape

    # Tiny pad-to-8 only if B is not a sublane multiple (rare in RL loops).
    Bp = _round_up(max(B, 1), 8)
    if Bp != B:
        f1p = jnp.pad(f1, ((0, Bp - B), (0, 0)))
        f2p = jnp.pad(f2, ((0, Bp - B), (0, 0)))
    else:
        f1p, f2p = f1, f2

    # Batch tile: one tile for small batches; large (<=1024) tiles for big
    # batches but always >= 2 grid steps so v7x megacore uses both cores.
    if Bp <= 512:
        TB = Bp
    else:
        TB = min(1024, _round_up(pl.cdiv(Bp, 2), 8))
    grid = pl.cdiv(Bp, TB)

    kernel = functools.partial(a2c_head_kernel, n_total=n_total, hidden=hidden)
    const2d = lambda shape: pl.BlockSpec(shape, lambda i: (0, 0))

    cost = pl.CostEstimate(
        flops=2 * Bp * 2 * F * ncols,
        transcendentals=Bp,
        bytes_accessed=4 * (Bp * 2 * F + Bp * ncols + 2 * F * ncols + 3 * ncols),
    )

    out = pl.pallas_call(
        kernel,
        out_shape=jax.ShapeDtypeStruct((Bp, ncols), jnp.float32),
        grid=(grid,),
        in_specs=[
            pl.BlockSpec((TB, F), lambda i: (i, 0)),            # f1 tile
            pl.BlockSpec((TB, F), lambda i: (i, 0)),            # f2 tile
            const2d((F, ncols)),                                # W_top (for f1)
            const2d((F, ncols)),                                # W_bot (for f2)
            const2d((1, ncols)),                                # packed bias
            const2d((1, ncols)),                                # folded gamma*w2
            pl.BlockSpec(memory_space=pltpu.MemorySpace.SMEM),  # folded bias scalar
        ],
        out_specs=pl.BlockSpec((TB, ncols), lambda i: (i, 0)),
        compiler_params=pltpu.CompilerParams(
            dimension_semantics=("parallel",)),
        cost_estimate=cost,
    )(f1p, f2p, packed["wt"], packed["wb"], packed["b"], packed["g2"],
      packed["b2"])

    # `feature` is a module output (used by get_recon_loss etc.); it is off
    # the kernel's critical path since the kernel reads f1/f2 directly.
    feature = jnp.concatenate([f1, f2], axis=1)

    # Single slice of the packed slab, then cheap per-head splits.
    head = out[:B, :n_total + 1]
    pol, val = head[:, :n_total], head[:, n_total:]
    offs = [0]
    for n in nvec:
        offs.append(offs[-1] + n)
    policy = [pol[:, offs[i]:offs[i + 1]] for i in range(len(nvec))]
    return policy, val, feature


# ---------------- parameter construction (deterministic) ----------------

def _linear_init(key, fan_in, fan_out):
    # matches PyTorch nn.Linear default: U(-1/sqrt(fan_in), 1/sqrt(fan_in))
    k1, k2 = jax.random.split(key)
    bound = 1.0 / float(fan_in) ** 0.5
    w = jax.random.uniform(k1, (fan_in, fan_out), jnp.float32, -bound, bound)
    b = jax.random.uniform(k2, (1, fan_out), jnp.float32, -bound, bound)
    return w, b


def make_params(key, feature_size, nvec):
    feat2 = 2 * feature_size
    hidden = feat2 // 2
    keys = jax.random.split(key, len(nvec) + 2)

    # actor heads: ActorLayer over discrete action spaces -> Linear(2F, n) each
    ws, bs = [], []
    for i, n in enumerate(nvec):
        w, b = _linear_init(keys[i], feat2, n)
        ws.append(w)
        bs.append(b)
    wa = jnp.concatenate(ws, axis=1)
    ba = jnp.concatenate(bs, axis=1)

    # critic block: Linear(2F, F) -> LeakyReLU(0.1) -> LayerNorm(F) -> Linear(F, 1)
    w1, b1 = _linear_init(keys[-2], feat2, hidden)
    w2, b2 = _linear_init(keys[-1], hidden, 1)
    gamma = jnp.ones((1, hidden), jnp.float32)
    beta = jnp.zeros((1, hidden), jnp.float32)

    return dict(wa=wa, ba=ba, w1=w1, b1=b1, gamma=gamma, beta=beta,
                w2=w2, b2=b2)


# ---------------- pure-JAX reference for verification ----------------

def reference_forward(f1, f2, params, nvec):
    x = jnp.concatenate([f1, f2], axis=1)
    pol = x @ params["wa"] + params["ba"]
    h = x @ params["w1"] + params["b1"]
    h = jnp.where(h > 0, h, 0.1 * h)
    mu = jnp.mean(h, axis=-1, keepdims=True)
    var = jnp.mean((h - mu) ** 2, axis=-1, keepdims=True)
    hn = (h - mu) / jnp.sqrt(var + 1e-5) * params["gamma"] + params["beta"]
    val = hn @ params["w2"] + params["b2"]
    offs = [0]
    for n in nvec:
        offs.append(offs[-1] + n)
    policy = [pol[:, offs[i]:offs[i + 1]] for i in range(len(nvec))]
    return policy, val, x


if __name__ == "__main__":
    key = jax.random.PRNGKey(0)
    k_f1, k_f2, k_p = jax.random.split(key, 3)

    feature_size = 32          # -> feature dim 2F = 64, critic hidden = 32
    batch = 8                  # sublane multiple; wrapper pads otherwise
    nvec = (5, 3, 4)           # discrete action heads (MultiDiscrete-style)

    f1 = jax.random.normal(k_f1, (batch, feature_size), jnp.float32)
    f2 = jax.random.normal(k_f2, (batch, feature_size), jnp.float32)
    params = make_params(k_p, feature_size, nvec)

    # Pack once (per weight update), outside the per-step forward path.
    packed, meta = pack_params(params)
    jax.block_until_ready(packed)

    policy, value, feature = a2c_forward(f1, f2, packed, nvec=nvec, **meta)
    jax.block_until_ready(value)

    ref_policy, ref_value, ref_feature = reference_forward(f1, f2, params, nvec)
    for p, rp in zip(policy, ref_policy):
        assert jnp.allclose(p, rp, atol=1e-4), "policy mismatch"
    assert jnp.allclose(value, ref_value, atol=1e-4), "value mismatch"
    assert jnp.allclose(feature, ref_feature, atol=1e-5), "feature mismatch"

    print("KERNEL_OK")
</pallas_src>

<mosaic_0001>
module attributes {stable_mosaic.version = 11 : i64} {
  func.func @a2c_head_kernel(%arg0: i32, %arg1: memref<8x32xf32, #tpu.memory_space<vmem>>, %arg2: memref<8x32xf32, #tpu.memory_space<vmem>>, %arg3: memref<32x128xf32, #tpu.memory_space<vmem>>, %arg4: memref<32x128xf32, #tpu.memory_space<vmem>>, %arg5: memref<1x128xf32, #tpu.memory_space<vmem>>, %arg6: memref<1x128xf32, #tpu.memory_space<vmem>>, %arg7: memref<1xf32, #tpu.memory_space<smem>>, %arg8: memref<8x128xf32, #tpu.memory_space<vmem>>) attributes {dimension_semantics = [#tpu.dimension_semantics<parallel>], iteration_bounds = array<i64: 1>, scalar_prefetch = 0 : i64, scratch_operands = 0 : i64, tpu.core_type = #tpu.core_type<tc>, window_params = [{transform_indices = @transform_0, window_bounds = array<i64: 8, 32>}, {transform_indices = @transform_1, window_bounds = array<i64: 8, 32>}, {pipeline_mode = #tpu.pipeline_mode<synchronous>, transform_indices = @transform_2, window_bounds = array<i64: 32, 128>}, {pipeline_mode = #tpu.pipeline_mode<synchronous>, transform_indices = @transform_3, window_bounds = array<i64: 32, 128>}, {pipeline_mode = #tpu.pipeline_mode<synchronous>, transform_indices = @transform_4, window_bounds = array<i64: 1, 128>}, {pipeline_mode = #tpu.pipeline_mode<synchronous>, transform_indices = @transform_5, window_bounds = array<i64: 1, 128>}, {transform_indices = @transform_6, window_bounds = array<i64: 1>}, {transform_indices = @transform_7, window_bounds = array<i64: 8, 128>}]} {
    %c0 = arith.constant 0 : index
    %c0_0 = arith.constant 0 : index
    %0 = vector.load %arg1[%c0, %c0_0] : memref<8x32xf32, #tpu.memory_space<vmem>>, vector<8x32xf32>
    %c0_1 = arith.constant 0 : index
    %c0_2 = arith.constant 0 : index
    %1 = vector.load %arg3[%c0_1, %c0_2] : memref<32x128xf32, #tpu.memory_space<vmem>>, vector<32x128xf32>
    %cst = arith.constant dense<0.000000e+00> : vector<8x128xf32>
    %2 = tpu.matmul %0, %1, %cst {dimension_numbers = #tpu.dot_dimension_numbers<[1], [0], [0], [1], [0, 0, 1, 1], [], []>} : vector<8x32xf32>, vector<32x128xf32>, vector<8x128xf32> -> vector<8x128xf32>
    %c0_3 = arith.constant 0 : index
    %c0_4 = arith.constant 0 : index
    %3 = vector.load %arg2[%c0_3, %c0_4] : memref<8x32xf32, #tpu.memory_space<vmem>>, vector<8x32xf32>
    %c0_5 = arith.constant 0 : index
    %c0_6 = arith.constant 0 : index
    %4 = vector.load %arg4[%c0_5, %c0_6] : memref<32x128xf32, #tpu.memory_space<vmem>>, vector<32x128xf32>
    %cst_7 = arith.constant dense<0.000000e+00> : vector<8x128xf32>
    %5 = tpu.matmul %3, %4, %cst_7 {dimension_numbers = #tpu.dot_dimension_numbers<[1], [0], [0], [1], [0, 0, 1, 1], [], []>} : vector<8x32xf32>, vector<32x128xf32>, vector<8x128xf32> -> vector<8x128xf32>
    %6 = arith.addf %2, %5 : vector<8x128xf32>
    %c0_8 = arith.constant 0 : index
    %c0_9 = arith.constant 0 : index
    %7 = vector.load %arg5[%c0_8, %c0_9] : memref<1x128xf32, #tpu.memory_space<vmem>>, vector<1x128xf32>
    %8 = vector.broadcast %7 : vector<1x128xf32> to vector<8x128xf32>
    %9 = arith.addf %6, %8 : vector<8x128xf32>
    %10 = tpu.iota {dimensions = array<i32: 1>} : vector<8x128xi32>
    %c12_i32 = arith.constant 12 : i32
    %11 = vector.broadcast %c12_i32 : i32 to vector<8x128xi32>
    %12 = arith.cmpi sge, %10, %11 : vector<8x128xi32>
    %c44_i32 = arith.constant 44 : i32
    %13 = vector.broadcast %c44_i32 : i32 to vector<8x128xi32>
    %14 = arith.cmpi slt, %10, %13 : vector<8x128xi32>
    %15 = arith.andi %12, %14 : vector<8x128xi1>
    %cst_10 = arith.constant 0.000000e+00 : f32
    %16 = vector.broadcast %cst_10 : f32 to vector<8x128xf32>
    %17 = arith.select %15, %9, %16 : vector<8x128xi1>, vector<8x128xf32>
    %cst_11 = arith.constant 0.000000e+00 : f32
    %18 = vector.broadcast %cst_11 : f32 to vector<8x128xf32>
    %19 = arith.cmpf ogt, %17, %18 : vector<8x128xf32>
    %cst_12 = arith.constant 1.000000e-01 : f32
    %20 = vector.broadcast %cst_12 : f32 to vector<8x128xf32>
    %21 = arith.mulf %20, %17 : vector<8x128xf32>
    %22 = arith.select %19, %17, %21 : vector<8x128xi1>, vector<8x128xf32>
    %cst_13 = arith.constant dense<0.000000e+00> : vector<8xf32>
    %23 = vector.multi_reduction <add>, %22, %cst_13 [1] : vector<8x128xf32> to vector<8xf32>
    %24 = vector.shape_cast %23 : vector<8xf32> to vector<8x1xf32>
    %cst_14 = arith.constant 3.125000e-02 : f32
    %25 = vector.broadcast %cst_14 : f32 to vector<8x1xf32>
    %26 = arith.mulf %24, %25 : vector<8x1xf32>
    %27 = vector.broadcast %26 : vector<8x1xf32> to vector<8x128xf32>
    %28 = arith.subf %22, %27 : vector<8x128xf32>
    %cst_15 = arith.constant 0.000000e+00 : f32
    %29 = vector.broadcast %cst_15 : f32 to vector<8x128xf32>
    %30 = arith.select %15, %28, %29 : vector<8x128xi1>, vector<8x128xf32>
    %31 = arith.mulf %30, %30 : vector<8x128xf32>
    %cst_16 = arith.constant dense<0.000000e+00> : vector<8xf32>
    %32 = vector.multi_reduction <add>, %31, %cst_16 [1] : vector<8x128xf32> to vector<8xf32>
    %33 = vector.shape_cast %32 : vector<8xf32> to vector<8x1xf32>
    %cst_17 = arith.constant 3.125000e-02 : f32
    %34 = vector.broadcast %cst_17 : f32 to vector<8x1xf32>
    %35 = arith.mulf %33, %34 : vector<8x1xf32>
    %cst_18 = arith.constant 9.99999974E-6 : f32
    %36 = vector.broadcast %cst_18 : f32 to vector<8x1xf32>
    %37 = arith.addf %35, %36 : vector<8x1xf32>
    %38 = math.rsqrt %37 : vector<8x1xf32>
    %c0_19 = arith.constant 0 : index
    %c0_20 = arith.constant 0 : index
    %39 = vector.load %arg6[%c0_19, %c0_20] : memref<1x128xf32, #tpu.memory_space<vmem>>, vector<1x128xf32>
    %40 = vector.broadcast %39 : vector<1x128xf32> to vector<8x128xf32>
    %41 = arith.mulf %30, %40 : vector<8x128xf32>
    %cst_21 = arith.constant dense<0.000000e+00> : vector<8xf32>
    %42 = vector.multi_reduction <add>, %41, %cst_21 [1] : vector<8x128xf32> to vector<8xf32>
    %43 = vector.shape_cast %42 : vector<8xf32> to vector<8x1xf32>
    %44 = arith.mulf %38, %43 : vector<8x1xf32>
    %c0_22 = arith.constant 0 : index
    %45 = memref.load %arg7[%c0_22] : memref<1xf32, #tpu.memory_space<smem>>
    %46 = vector.broadcast %45 : f32 to vector<8x1xf32>
    %47 = arith.addf %44, %46 : vector<8x1xf32>
    %c12_i32_23 = arith.constant 12 : i32
    %48 = vector.broadcast %c12_i32_23 : i32 to vector<8x128xi32>
    %49 = arith.cmpi slt, %10, %48 : vector<8x128xi32>
    %cst_24 = arith.constant 0.000000e+00 : f32
    %50 = vector.broadcast %cst_24 : f32 to vector<8x128xf32>
    %51 = arith.select %49, %9, %50 : vector<8x128xi1>, vector<8x128xf32>
    %c12_i32_25 = arith.constant 12 : i32
    %52 = vector.broadcast %c12_i32_25 : i32 to vector<8x128xi32>
    %53 = arith.cmpi eq, %10, %52 : vector<8x128xi32>
    %cst_26 = arith.constant 0.000000e+00 : f32
    %54 = vector.shape_cast %47 : vector<8x1xf32> to vector<8x1xf32>
    %55 = vector.broadcast %54 : vector<8x1xf32> to vector<8x128xf32>
    %56 = vector.broadcast %cst_26 : f32 to vector<8x128xf32>
    %57 = arith.select %53, %55, %56 : vector<8x128xi1>, vector<8x128xf32>
    %58 = arith.addf %51, %57 : vector<8x128xf32>
    %c0_27 = arith.constant 0 : index
    %c0_28 = arith.constant 0 : index
    %59 = vector.load %arg8[%c0_27, %c0_28] : memref<8x128xf32, #tpu.memory_space<vmem>>, vector<8x128xf32>
    tpu.vector_store %arg8[%c0_27, %c0_28], %58 {strides = array<i32>} : memref<8x128xf32, #tpu.memory_space<vmem>>, vector<8x128xf32>,
    return
  }
  func.func @transform_0(%arg0: i32) -> (i32, i32) {
    %c0_i32 = arith.constant 0 : i32
    %c0_i32_0 = arith.constant 0 : i32
    return %arg0, %c0_i32 : i32, i32
  }
  func.func @transform_1(%arg0: i32) -> (i32, i32) {
    %c0_i32 = arith.constant 0 : i32
    %c0_i32_0 = arith.constant 0 : i32
    return %arg0, %c0_i32 : i32, i32
  }
  func.func @transform_2(%arg0: i32) -> (i32, i32) {
    %c0_i32 = arith.constant 0 : i32
    %c0_i32_0 = arith.constant 0 : i32
    %c0_i32_1 = arith.constant 0 : i32
    return %c0_i32, %c0_i32_0 : i32, i32
  }
  func.func @transform_3(%arg0: i32) -> (i32, i32) {
    %c0_i32 = arith.constant 0 : i32
    %c0_i32_0 = arith.constant 0 : i32
    %c0_i32_1 = arith.constant 0 : i32
    return %c0_i32, %c0_i32_0 : i32, i32
  }
  func.func @transform_4(%arg0: i32) -> (i32, i32) {
    %c0_i32 = arith.constant 0 : i32
    %c0_i32_0 = arith.constant 0 : i32
    %c0_i32_1 = arith.constant 0 : i32
    return %c0_i32, %c0_i32_0 : i32, i32
  }
  func.func @transform_5(%arg0: i32) -> (i32, i32) {
    %c0_i32 = arith.constant 0 : i32
    %c0_i32_0 = arith.constant 0 : i32
    %c0_i32_1 = arith.constant 0 : i32
    return %c0_i32, %c0_i32_0 : i32, i32
  }
  func.func @transform_6(%arg0: i32) -> i32 {
    %c0_i32 = arith.constant 0 : i32
    %c0_i32_0 = arith.constant 0 : i32
    return %c0_i32 : i32
  }
  func.func @transform_7(%arg0: i32) -> (i32, i32) {
    %c0_i32 = arith.constant 0 : i32
    %c0_i32_0 = arith.constant 0 : i32
    return %arg0, %c0_i32 : i32, i32
  }
}

</mosaic_0001>

<bundles_post_ra>
// kernel: a2c_forward.1
= control target key start
LH: loop header
LB: loop body
LE: loop exit
PB: predicated region body
PF: predicated region fallthrough
CT: control target
= control target key end

     0   :  { %13 = vsyncpa [#allocation4], 0  ;;  %s385_s0 = inlined_call_operand.hbm [shape: f32[8,32], index: 0, kind: input, shape index: {}]   ;;  %s386_s1 = inlined_call_operand.hbm [shape: f32[8,32], index: 1, kind: input, shape index: {}]   ;;  %s387_s2 = inlined_call_operand.hbm [shape: f32[32,128], index: 2, kind: input, shape index: {}]   ;;  %s388_s3 = inlined_call_operand.hbm [shape: f32[32,128], index: 3, kind: input, shape index: {}]   ;;  %s389_s4 = inlined_call_operand.vmem [shape: f32[1,128], index: 4, kind: input, shape index: {}]   ;;  %s390_s5 = inlined_call_operand.vmem [shape: f32[1,128], index: 5, kind: input, shape index: {}]   ;;  %s391_s6 = inlined_call_operand.<no memory space> [shape: f32[1], index: 6, kind: input, shape index: {}]   ;;  %s392_s7 = inlined_call_operand.vmem [shape: f32[8,128], index: 7, kind: output, shape index: {}]  }
   0x1   :  { %14 = vsyncpa [#allocation6], 0  ;;  %s32_s26 = sshll.u32 %s386_s1, 4  ;;  %s33_s26 = int_to_ptr.hbm [resolvable:$true] %s32_s26 }
   0x2   :  { %15 = vsyncpa [#allocation9], 0  ;;  %s315_s27 = smov [#allocation5]   ;;  %s21_s8 = sshll.u32 %s385_s0, 4  ;;  %s22_s8 = int_to_ptr.hbm [resolvable:$true] %s21_s8 }
   0x3   :  { %s34_s28 = sshll.u32 %s315_s27, 4  ;;  %s316_s9 = smov [#allocation3]   ;;  %s35_s28 = int_to_ptr.vmem [resolvable:$true] %s34_s28 }
   0x4   :  { %37 = dma.hbm_to_vmem [thread:$0]  %s33_s26, 128, %s35_s28, [#allocation6]  }
   0x5   :  { %s23_s10 = sshll.u32 %s316_s9, 4  ;;  %s42_s13 = sshll.u32 %s387_s2, 4  ;;  %s24_s10 = int_to_ptr.vmem [resolvable:$true] %s23_s10  ;;  %s43_s13 = int_to_ptr.hbm [resolvable:$true] %s42_s13 }
   0x6   :  { %26 = dma.hbm_to_vmem [thread:$0]  %s22_s8, 128, %s24_s10, [#allocation4]  }
   0x7   :  { %s317_s1 = smov [#allocation7]   ;;  %s55_s17 = sshll.u32 %s388_s3, 4  ;;  %s56_s17 = int_to_ptr.hbm [resolvable:$true] %s55_s17 }
   0x8   :  { %s44_s14 = sshll.u32 %s317_s1, 4  ;;  %s318_s18 = smov 128   ;;  %s45_s14 = int_to_ptr.vmem [resolvable:$true] %s44_s14 }
   0x9   :  { %s319_s0 = smov 8   ;;  %s320_s19 = smov [#allocation8]  }
   0xa   :  { %50 = dma.hbm_to_vmem [thread:$0]  %s43_s13, 512, %s45_s14, [#allocation6], %s318_s18, %s318_s18, %s319_s0  }
   0xb   :  { %s57_s20 = sshll.u32 %s320_s19, 4  ;;  %s58_s20 = int_to_ptr.vmem [resolvable:$true] %s57_s20 }
   0xc   :  { %63 = dma.hbm_to_vmem [thread:$0]  %s56_s17, 512, %s58_s20, [#allocation9], %s318_s18, %s318_s18, %s319_s0  }
   0xd   :  { %309 = dma.done.wait [#allocation4], 128  }
   0xe   :  { %310 = vsyncadd [#allocation4], 4294967168 }
   0xf   :  { %311 = dma.done.wait [#allocation6], 640  }
  0x10   :  { %312 = vsyncadd [#allocation6], 4294966656 }
  0x11   :  { %313 = dma.done.wait [#allocation9], 512  }
  0x12   :  { %314 = vsyncadd [#allocation9], 4294966784  ;;  %v95_v0 = vld [vmem:[#allocation8 + $0x18] sm:$0xff]  ;;  %v94_v2 = vld [vmem:[#allocation8 + $0x10] sm:$0xff]  ;;  %vm96_vm0 = vcmask 261120   ;;  %v148_v10 = vlaneseq  ;;  %v186_v37 = vstv %s391_s6 }
  0x13   :  { %v90_v1 = vld [vmem:[#allocation7 + $0x18] sm:$0xff]  ;;  %112 = vmatpush.msra.mxu0 %v95_v0  ;;  %v89_v3 = vld [vmem:[#allocation7 + $0x10] sm:$0xff]  ;;  %v93_v4 = vld [vmem:[#allocation8 + $0x8] sm:$0xff] }
  0x14   :  { %135 = vmatpush.msra.mxu1 %v90_v1  ;;  %v88_v5 = vld [vmem:[#allocation7 + $0x8] sm:$0xff]  ;;  %v92_v6 = vld [vmem:[#allocation8] sm:$0xff]  ;;  %v91_v8 = vld [vmem:[#allocation5] sm:$0xff]  ;;  %v149_v11 = vand.u32 127, %v148_v10 }
  0x15   :  { %113 = vmatpush.msra.mxu0 %v94_v2  ;;  %v87_v7 = vld [vmem:[#allocation7] sm:$0xff]  ;;  %v86_v9 = vld [vmem:[#allocation3] sm:$0xff] }
  0x16   :  { %136 = vmatpush.msra.mxu1 %v89_v3  ;;  %v209_v12 = vld [vmem:[%s389_s4] ss:$0 sm:$0xff]  ;;  %vm150_vm1 = vcmp.ge.s32.totalorder %v149_v11, 12  ;;  %vm151_vm2 = vcmp.lt.s32.totalorder %v149_v11, 44  ;;  %vm188_vm8 = vcmp.lt.s32.totalorder %v149_v11, 12  ;;  %vm190_vm9 = vcmp.eq.s32.totalorder %v149_v11, 12 }
  0x17   :  { %114 = vmatpush.msra.mxu0 %v93_v4  ;;  %vm152_vm3 = vmand %vm150_vm1, %vm151_vm2  ;;  %v210_v22 = vld [vmem:[%s390_s5] ss:$0 sm:$0xff] }
  0x18   :  { %137 = vmatpush.msra.mxu1 %v88_v5 }
  0x19   :  { %115 = vmatpush.msra.mxu0 %v92_v6 }
  0x1a   :  { %138 = vmatpush.msra.mxu1 %v87_v7  ;;  %201 = vmatmul.msk.f32.vlgmr.msra.gmra.mxu0 %vm96_vm0, %v91_v8 }
  0x1b   :  { %202 = vmatmul.msk.f32.vlgmr.msra.gmra.mxu1 %vm96_vm0, %v86_v9 }
  0x97   :  { %v117_v13 = vpop.f32.mrf.mxu0 }
  0x98   :  { %v140_v14 = vpop.f32.mrf.mxu1 }
  0x99   :  { %v141_v15 = vadd.f32 %v140_v14, %v117_v13 }
  0x9b   :  { %v147_v16 = vadd.f32 %v209_v12, %v141_v15 }
  0x9d   :  { %v153_v17 = vsel %vm152_vm3, %v147_v16, 0.0  ;;  %v189_v41 = vsel %vm188_vm8, %v147_v16, 0.0 }
  0x9e   :  { %vm154_vm4 = vcmp.gt.f32.partialorder %v153_v17, 0.0  ;;  %v155_v18 = vmul.f32 0.1, %v153_v17 }
  0xa0   :  { %v156_v19 = vsel %vm154_vm4, %v153_v17, %v155_v18 }
  0xa1   :  { %157 = vadd.xlane.f32.xlu0 %v156_v19 }
 0x114   :  { %v158_v20 = vpop.xlane.xlu0 %157 }
 0x115   :  { %v159_v21 = vmul.f32 0.03125, %v158_v20 }
 0x117   :  { %v160_v23 = vsub.f32 %v156_v19, %v159_v21 }
 0x119   :  { %v161_v24 = vsel %vm152_vm3, %v160_v23, 0.0 }
 0x11a   :  { %v181_v25 = vmul.f32 %v210_v22, %v161_v24  ;;  %v162_v26 = vmul.f32 %v161_v24, %v161_v24 }
 0x11c   :  { %182 = vadd.xlane.f32.xlu1 %v181_v25  ;;  %163 = vadd.xlane.f32.xlu0 %v162_v26 }
 0x18f   :  { %v164_v27 = vpop.xlane.xlu0 %163  ;;  %v183_v36 = vpop.xlane.xlu1 %182 }
 0x190   :  { %v165_v28 = vmul.f32 0.03125, %v164_v27 }
 0x192   :  { %v166_v29 = vadd.f32 1e-05, %v165_v28 }
 0x194   :  { %211 = vrsqrt.f32 %v166_v29  ;;  %vm173_vm6 = vweird.f32 %v166_v29 }
 0x19a   :  { %v212_v30 = vpop.eup %211 }
 0x19b   :  { %v168_v31 = vmul.f32 %v212_v30, %v166_v29  ;;  %vm174_vm5 = vweird.f32 %v212_v30 }
 0x19c   :  { %vm175_vm7 = vmor %vm173_vm6, %vm174_vm5 }
 0x19d   :  { %v169_v32 = vmul.f32 %v212_v30, %v168_v31 }
 0x19f   :  { %v170_v33 = vmul.f32 0.5, %v169_v32 }
 0x1a1   :  { %v171_v34 = vsub.f32 1.5, %v170_v33 }
 0x1a3   :  { %v172_v35 = vmul.f32 %v212_v30, %v171_v34 }
 0x1a5   :  { %v176_v38 = vsel %vm175_vm7, %v212_v30, %v172_v35 }
 0x1a6   :  { %v184_v39 = vmul.f32 %v183_v36, %v176_v38 }
 0x1a8   :  { %v187_v40 = vadd.f32 %v186_v37, %v184_v39 }
 0x1aa   :  { %v191_v42 = vsel %vm190_vm9, %v187_v40, 0.0 }
 0x1ab   :  { %v192_v43 = vadd.f32 %v191_v42, %v189_v41 }
 0x1ad   :  { %193 = vst [vmem:[%s392_s7] sm:$0xff] %v192_v43 }
 0x1ae   :  { %198 = vsyncpa [#allocation4], 1 }
 0x1af   :  { %199 = vsyncpa [#allocation6], 1 }
 0x1b0   :  { %200 = vsyncpa [#allocation9], 1 }

</bundles_post_ra>
